<compile_context>
chip_gen: v5e
topology: v5e:2x2
jax: 0.10.0
libtpu: 0.0.40
codegen_flags: <defaults>
</compile_context>

<pallas_src>
import jax
import jax.numpy as jnp
from jax.experimental import pallas as pl
from jax.experimental.pallas import tpu as pltpu

N_EMBD = 384
HEAD_SIZE = 64
BLOCK_SIZE = 256   # matches the PyTorch module's tril buffer / block_size
NEG_INF = -1e30    # finite large-negative: avoids exp(-inf - -inf) NaN hazards


# ---------------------------------------------------------------------------
# Fused kernel: QKV projection + causal flash attention, one (b, q-tile) step.
# ---------------------------------------------------------------------------
def head_kernel(x_ref, wq_ref, wk_ref, wv_ref, o_ref, k_sc, v_sc):
    qi = pl.program_id(1)
    T, H = k_sc.shape
    tq = o_ref.shape[1]

    # ---- Project K / V for the whole sequence once per batch row ----------
    @pl.when(qi == 0)
    def _project_kv():
        xb = x_ref[0].astype(jnp.bfloat16)                         # (T, C)
        k_sc[...] = jnp.dot(
            xb, wk_ref[...], preferred_element_type=jnp.float32
        ).astype(jnp.bfloat16)
        v_sc[...] = jnp.dot(
            xb, wv_ref[...], preferred_element_type=jnp.float32
        ).astype(jnp.bfloat16)

    # ---- Project the current q tile (1/sqrt(H) already folded into wq) ----
    q_start = pl.multiple_of(qi * tq, tq)
    xq = x_ref[0, pl.ds(q_start, tq), :].astype(jnp.bfloat16)      # (tq, C)
    q = jnp.dot(
        xq, wq_ref[...], preferred_element_type=jnp.float32
    ).astype(jnp.bfloat16)                                         # (tq, H)

    # ---- Online softmax over the causally-visible kv tiles (ki <= qi) -----
    row = q_start + jax.lax.broadcasted_iota(jnp.int32, (tq, tq), 0)

    def kv_step(ki, carry):
        m_prev, l_prev, acc_prev = carry
        k_start = pl.multiple_of(ki * tq, tq)
        k = k_sc[pl.ds(k_start, tq), :]                            # (tq, H) bf16
        v = v_sc[pl.ds(k_start, tq), :]                            # (tq, H) bf16

        # q @ k^T without materializing k.T: contract the last dims.
        s = jax.lax.dot_general(
            q, k, (((1,), (1,)), ((), ())),
            preferred_element_type=jnp.float32)                    # (tq, tq) f32

        # Causal mask via global indices (no-op on fully-visible tiles).
        col = k_start + jax.lax.broadcasted_iota(jnp.int32, (tq, tq), 1)
        s = jnp.where(col <= row, s, NEG_INF)

        m_new = jnp.maximum(m_prev, jnp.max(s, axis=-1, keepdims=True))
        alpha = jnp.exp(m_prev - m_new)
        p = jnp.exp(s - m_new)
        l_new = alpha * l_prev + jnp.sum(p, axis=-1, keepdims=True)
        acc_new = alpha * acc_prev + jnp.dot(
            p.astype(jnp.bfloat16), v, preferred_element_type=jnp.float32)
        return m_new, l_new, acc_new

    m0 = jnp.full((tq, 1), NEG_INF, jnp.float32)
    l0 = jnp.zeros((tq, 1), jnp.float32)
    acc0 = jnp.zeros((tq, H), jnp.float32)
    m, l, acc = jax.lax.fori_loop(0, qi + 1, kv_step, (m0, l0, acc0))

    o_ref[0] = (acc * pl.reciprocal(l, approx=True)).astype(o_ref.dtype)


# ---------------------------------------------------------------------------
# Wrapper
# ---------------------------------------------------------------------------
def head_forward(x, wq, wk, wv):
    """x: (B, T, C) f32; w*: (C, H) f32 -> (B, T, H) f32. Eval-mode Head."""
    B, T, C = x.shape
    H = wq.shape[1]

    tq = min(T, 256)
    assert T % tq == 0, "T must be a multiple of the q tile"
    nq = T // tq

    # Fold 1/sqrt(H) into the query weight; cast all weights to bf16 once.
    scale = 1.0 / float(H) ** 0.5
    wq_b = (wq * scale).astype(jnp.bfloat16)
    wk_b = wk.astype(jnp.bfloat16)
    wv_b = wv.astype(jnp.bfloat16)

    cost = pl.CostEstimate(
        flops=2 * B * T * C * 3 * H + 2 * B * T * T * H,     # QKV proj + causal attn
        transcendentals=B * T * T // 2,                      # exp on visible tiles
        bytes_accessed=B * T * C * 4 + 3 * C * H * 2 + B * T * H * 4)

    out = pl.pallas_call(
        head_kernel,
        out_shape=jax.ShapeDtypeStruct((B, T, H), x.dtype),
        grid_spec=pltpu.PrefetchScalarGridSpec(
            num_scalar_prefetch=0,
            grid=(B, nq),
            in_specs=[
                # Full x row per batch; block index independent of qi -> one
                # DMA per batch row.
                pl.BlockSpec((1, T, C), lambda b, qi: (b, 0, 0)),
                pl.BlockSpec((C, H), lambda b, qi: (0, 0)),   # wq (pre-scaled)
                pl.BlockSpec((C, H), lambda b, qi: (0, 0)),   # wk
                pl.BlockSpec((C, H), lambda b, qi: (0, 0)),   # wv
            ],
            out_specs=pl.BlockSpec((1, tq, H), lambda b, qi: (b, qi, 0)),
            scratch_shapes=[
                pltpu.VMEM((T, H), jnp.bfloat16),   # projected K (per batch row)
                pltpu.VMEM((T, H), jnp.bfloat16),   # projected V (per batch row)
            ],
        ),
        compiler_params=pltpu.CompilerParams(
            dimension_semantics=("parallel", "arbitrary")),
        cost_estimate=cost,
    )(x, wq_b, wk_b, wv_b)
    return out


def head_forward_ref(x, wq, wk, wv):
    """Pure-JAX f32 reference (matches the PyTorch module in eval mode)."""
    q = x @ wq
    k = x @ wk
    v = x @ wv
    wei = (q @ jnp.swapaxes(k, -2, -1)) * (k.shape[-1] ** -0.5)
    T = x.shape[1]
    mask = jnp.tril(jnp.ones((T, T), dtype=bool))
    wei = jnp.where(mask, wei, -jnp.inf)
    wei = jax.nn.softmax(wei, axis=-1)
    return wei @ v


def _check(B, T, key):
    kx, kq, kk, kv = jax.random.split(key, 4)
    x = jax.random.normal(kx, (B, T, N_EMBD), dtype=jnp.float32)
    bound = 1.0 / float(N_EMBD) ** 0.5
    wq = jax.random.uniform(kq, (N_EMBD, HEAD_SIZE), jnp.float32, -bound, bound)
    wk = jax.random.uniform(kk, (N_EMBD, HEAD_SIZE), jnp.float32, -bound, bound)
    wv = jax.random.uniform(kv, (N_EMBD, HEAD_SIZE), jnp.float32, -bound, bound)

    out = jax.block_until_ready(head_forward(x, wq, wk, wv))
    ref = head_forward_ref(x, wq, wk, wv)
    assert out.shape == (B, T, HEAD_SIZE)
    # bf16 MXU matmuls + approx reciprocal vs pure-f32 reference.
    err = float(jnp.max(jnp.abs(out - ref)))
    assert jnp.allclose(out, ref, atol=2e-2, rtol=2e-2), (
        f"mismatch vs reference (B={B}, T={T}), max abs err={err}")


if __name__ == "__main__":
    key = jax.random.PRNGKey(0)
    k_small, k_full = jax.random.split(key)
    _check(B=2, T=8, key=k_small)            # small smoke test (single tile)
    _check(B=2, T=BLOCK_SIZE, key=k_full)    # full block_size path
    print("KERNEL_OK")
</pallas_src>

<mosaic_0001>
module attributes {stable_mosaic.version = 11 : i64} {
  func.func @head_kernel(%arg0: i32, %arg1: i32, %arg2: memref<1x8x384xf32, #tpu.memory_space<vmem>>, %arg3: memref<384x64xbf16, #tpu.memory_space<vmem>>, %arg4: memref<384x64xbf16, #tpu.memory_space<vmem>>, %arg5: memref<384x64xbf16, #tpu.memory_space<vmem>>, %arg6: memref<1x8x64xf32, #tpu.memory_space<vmem>>, %arg7: memref<8x64xbf16, #tpu.memory_space<vmem>>, %arg8: memref<8x64xbf16, #tpu.memory_space<vmem>>) attributes {dimension_semantics = [#tpu.dimension_semantics<parallel>, #tpu.dimension_semantics<arbitrary>], iteration_bounds = array<i64: 2, 1>, scalar_prefetch = 0 : i64, scratch_operands = 2 : i64, tpu.core_type = #tpu.core_type<tc>, window_params = [{transform_indices = @transform_0, window_bounds = array<i64: 1, 8, 384>}, {pipeline_mode = #tpu.pipeline_mode<synchronous>, transform_indices = @transform_1, window_bounds = array<i64: 384, 64>}, {pipeline_mode = #tpu.pipeline_mode<synchronous>, transform_indices = @transform_2, window_bounds = array<i64: 384, 64>}, {pipeline_mode = #tpu.pipeline_mode<synchronous>, transform_indices = @transform_3, window_bounds = array<i64: 384, 64>}, {transform_indices = @transform_4, window_bounds = array<i64: 1, 8, 64>}]} {
    %c0_i32 = arith.constant 0 : i32
    %0 = arith.cmpi eq, %arg1, %c0_i32 : i32
    %1 = arith.extui %0 : i1 to i32
    %c0_i32_0 = arith.constant 0 : i32
    %2 = arith.cmpi ne, %1, %c0_i32_0 : i32
    scf.if %2 {
      %c0_12 = arith.constant 0 : index
      %c0_13 = arith.constant 0 : index
      %c0_14 = arith.constant 0 : index
      %28 = vector.load %arg2[%c0_12, %c0_13, %c0_14] : memref<1x8x384xf32, #tpu.memory_space<vmem>>, vector<1x8x384xf32>
      %29 = vector.shape_cast %28 : vector<1x8x384xf32> to vector<8x384xf32>
      %30 = arith.truncf %29 : vector<8x384xf32> to vector<8x384xbf16>
      %c0_15 = arith.constant 0 : index
      %c0_16 = arith.constant 0 : index
      %31 = vector.load %arg4[%c0_15, %c0_16] : memref<384x64xbf16, #tpu.memory_space<vmem>>, vector<384x64xbf16>
      %cst_17 = arith.constant dense<0.000000e+00> : vector<8x64xf32>
      %32 = tpu.matmul %30, %31, %cst_17 {dimension_numbers = #tpu.dot_dimension_numbers<[1], [0], [0], [1], [0, 0, 1, 1], [], []>} : vector<8x384xbf16>, vector<384x64xbf16>, vector<8x64xf32> -> vector<8x64xf32>
      %33 = arith.truncf %32 : vector<8x64xf32> to vector<8x64xbf16>
      %c0_18 = arith.constant 0 : index
      %c0_19 = arith.constant 0 : index
      %34 = vector.load %arg7[%c0_18, %c0_19] : memref<8x64xbf16, #tpu.memory_space<vmem>>, vector<8x64xbf16>
      tpu.vector_store %arg7[%c0_18, %c0_19], %33 {strides = array<i32>} : memref<8x64xbf16, #tpu.memory_space<vmem>>, vector<8x64xbf16>,
      %c0_20 = arith.constant 0 : index
      %c0_21 = arith.constant 0 : index
      %35 = vector.load %arg5[%c0_20, %c0_21] : memref<384x64xbf16, #tpu.memory_space<vmem>>, vector<384x64xbf16>
      %cst_22 = arith.constant dense<0.000000e+00> : vector<8x64xf32>
      %36 = tpu.matmul %30, %35, %cst_22 {dimension_numbers = #tpu.dot_dimension_numbers<[1], [0], [0], [1], [0, 0, 1, 1], [], []>} : vector<8x384xbf16>, vector<384x64xbf16>, vector<8x64xf32> -> vector<8x64xf32>
      %37 = arith.truncf %36 : vector<8x64xf32> to vector<8x64xbf16>
      %c0_23 = arith.constant 0 : index
      %c0_24 = arith.constant 0 : index
      %38 = vector.load %arg8[%c0_23, %c0_24] : memref<8x64xbf16, #tpu.memory_space<vmem>>, vector<8x64xbf16>
      tpu.vector_store %arg8[%c0_23, %c0_24], %37 {strides = array<i32>} : memref<8x64xbf16, #tpu.memory_space<vmem>>, vector<8x64xbf16>,
    } else {
    }
    %c8_i32 = arith.constant 8 : i32
    %3 = arith.muli %arg1, %c8_i32 : i32
    %4 = tpu.assume_multiple %3, 8 : i32
    %c0 = arith.constant 0 : index
    %5 = arith.index_cast %4 : i32 to index
    %c0_1 = arith.constant 0 : index
    %6 = vector.load %arg2[%c0, %5, %c0_1] : memref<1x8x384xf32, #tpu.memory_space<vmem>>, vector<1x8x384xf32>
    %7 = vector.shape_cast %6 : vector<1x8x384xf32> to vector<8x384xf32>
    %8 = arith.truncf %7 : vector<8x384xf32> to vector<8x384xbf16>
    %c0_2 = arith.constant 0 : index
    %c0_3 = arith.constant 0 : index
    %9 = vector.load %arg3[%c0_2, %c0_3] : memref<384x64xbf16, #tpu.memory_space<vmem>>, vector<384x64xbf16>
    %cst = arith.constant dense<0.000000e+00> : vector<8x64xf32>
    %10 = tpu.matmul %8, %9, %cst {dimension_numbers = #tpu.dot_dimension_numbers<[1], [0], [0], [1], [0, 0, 1, 1], [], []>} : vector<8x384xbf16>, vector<384x64xbf16>, vector<8x64xf32> -> vector<8x64xf32>
    %11 = arith.truncf %10 : vector<8x64xf32> to vector<8x64xbf16>
    %12 = tpu.iota {dimensions = array<i32: 0>} : vector<8x8xi32>
    %13 = vector.broadcast %4 : i32 to vector<8x8xi32>
    %14 = arith.addi %13, %12 : vector<8x8xi32>
    %cst_4 = arith.constant -1.000000e+30 : f32
    %15 = vector.broadcast %cst_4 : f32 to vector<8x1xf32>
    %cst_5 = arith.constant 0.000000e+00 : f32
    %16 = vector.broadcast %cst_5 : f32 to vector<8x1xf32>
    %cst_6 = arith.constant 0.000000e+00 : f32
    %17 = vector.broadcast %cst_6 : f32 to vector<8x64xf32>
    %c1_i32 = arith.constant 1 : i32
    %18 = arith.addi %arg1, %c1_i32 : i32
    %c0_i32_7 = arith.constant 0 : i32
    %19 = arith.subi %18, %c0_i32_7 : i32
    %20 = arith.addi %c0_i32_7, %19 : i32
    %c1_i32_8 = arith.constant 1 : i32
    %21:3 = scf.for %arg9 = %c0_i32_7 to %20 step %c1_i32_8 iter_args(%arg10 = %15, %arg11 = %16, %arg12 = %17) -> (vector<8x1xf32>, vector<8x1xf32>, vector<8x64xf32>)  : i32 {
      %c8_i32_12 = arith.constant 8 : i32
      %28 = arith.muli %arg9, %c8_i32_12 : i32
      %29 = tpu.assume_multiple %28, 8 : i32
      %30 = arith.index_cast %29 : i32 to index
      %c0_13 = arith.constant 0 : index
      %31 = vector.load %arg7[%30, %c0_13] : memref<8x64xbf16, #tpu.memory_space<vmem>>, vector<8x64xbf16>
      %32 = arith.index_cast %29 : i32 to index
      %c0_14 = arith.constant 0 : index
      %33 = vector.load %arg8[%32, %c0_14] : memref<8x64xbf16, #tpu.memory_space<vmem>>, vector<8x64xbf16>
      %cst_15 = arith.constant dense<0.000000e+00> : vector<8x8xf32>
      %34 = tpu.matmul %11, %31, %cst_15 {dimension_numbers = #tpu.dot_dimension_numbers<[1], [1], [0], [0], [0, 0, 1, 0], [], []>} : vector<8x64xbf16>, vector<8x64xbf16>, vector<8x8xf32> -> vector<8x8xf32>
      %35 = tpu.iota {dimensions = array<i32: 1>} : vector<8x8xi32>
      %36 = vector.broadcast %29 : i32 to vector<8x8xi32>
      %37 = arith.addi %36, %35 : vector<8x8xi32>
      %38 = arith.cmpi sle, %37, %14 : vector<8x8xi32>
      %cst_16 = arith.constant -1.000000e+30 : f32
      %39 = vector.broadcast %cst_16 : f32 to vector<8x8xf32>
      %40 = arith.select %38, %34, %39 : vector<8x8xi1>, vector<8x8xf32>
      %cst_17 = arith.constant dense<0xFF800000> : vector<8xf32>
      %41 = vector.multi_reduction <maximumf>, %40, %cst_17 [1] : vector<8x8xf32> to vector<8xf32>
      %42 = vector.shape_cast %41 : vector<8xf32> to vector<8x1xf32>
      %43 = arith.maximumf %arg10, %42 : vector<8x1xf32>
      %44 = arith.subf %arg10, %43 : vector<8x1xf32>
      %45 = math.exp %44 : vector<8x1xf32>
      %46 = vector.broadcast %43 : vector<8x1xf32> to vector<8x8xf32>
      %47 = arith.subf %40, %46 : vector<8x8xf32>
      %48 = math.exp %47 : vector<8x8xf32>
      %49 = arith.mulf %45, %arg11 : vector<8x1xf32>
      %cst_18 = arith.constant dense<0.000000e+00> : vector<8xf32>
      %50 = vector.multi_reduction <add>, %48, %cst_18 [1] : vector<8x8xf32> to vector<8xf32>
      %51 = vector.shape_cast %50 : vector<8xf32> to vector<8x1xf32>
      %52 = arith.addf %49, %51 : vector<8x1xf32>
      %53 = vector.broadcast %45 : vector<8x1xf32> to vector<8x64xf32>
      %54 = arith.mulf %53, %arg12 : vector<8x64xf32>
      %55 = arith.truncf %48 : vector<8x8xf32> to vector<8x8xbf16>
      %cst_19 = arith.constant dense<0.000000e+00> : vector<8x64xf32>
      %56 = tpu.matmul %55, %33, %cst_19 {dimension_numbers = #tpu.dot_dimension_numbers<[1], [0], [0], [1], [0, 0, 1, 1], [], []>} : vector<8x8xbf16>, vector<8x64xbf16>, vector<8x64xf32> -> vector<8x64xf32>
      %57 = arith.addf %54, %56 : vector<8x64xf32>
      scf.yield %43, %52, %57 : vector<8x1xf32>, vector<8x1xf32>, vector<8x64xf32>
    }
    %22 = tpu.reciprocal %21#1 {approx = true} : vector<8x1xf32> -> vector<8x1xf32>
    %23 = vector.broadcast %22 : vector<8x1xf32> to vector<8x64xf32>
    %24 = arith.mulf %21#2, %23 : vector<8x64xf32>
    %c0_9 = arith.constant 0 : index
    %c0_10 = arith.constant 0 : index
    %c0_11 = arith.constant 0 : index
    %25 = vector.load %arg6[%c0_9, %c0_10, %c0_11] : memref<1x8x64xf32, #tpu.memory_space<vmem>>, vector<1x8x64xf32>
    %26 = vector.shape_cast %25 : vector<1x8x64xf32> to vector<8x64xf32>
    %27 = vector.shape_cast %24 : vector<8x64xf32> to vector<1x8x64xf32>
    tpu.vector_store %arg6[%c0_9, %c0_10, %c0_11], %27 {strides = array<i32>} : memref<1x8x64xf32, #tpu.memory_space<vmem>>, vector<1x8x64xf32>,
    return
  }
  func.func @transform_0(%arg0: i32, %arg1: i32) -> (i32, i32, i32) {
    %c0_i32 = arith.constant 0 : i32
    %c0_i32_0 = arith.constant 0 : i32
    %c0_i32_1 = arith.constant 0 : i32
    return %arg0, %c0_i32, %c0_i32_0 : i32, i32, i32
  }
  func.func @transform_1(%arg0: i32, %arg1: i32) -> (i32, i32) {
    %c0_i32 = arith.constant 0 : i32
    %c0_i32_0 = arith.constant 0 : i32
    %c0_i32_1 = arith.constant 0 : i32
    return %c0_i32, %c0_i32_0 : i32, i32
  }
  func.func @transform_2(%arg0: i32, %arg1: i32) -> (i32, i32) {
    %c0_i32 = arith.constant 0 : i32
    %c0_i32_0 = arith.constant 0 : i32
    %c0_i32_1 = arith.constant 0 : i32
    return %c0_i32, %c0_i32_0 : i32, i32
  }
  func.func @transform_3(%arg0: i32, %arg1: i32) -> (i32, i32) {
    %c0_i32 = arith.constant 0 : i32
    %c0_i32_0 = arith.constant 0 : i32
    %c0_i32_1 = arith.constant 0 : i32
    return %c0_i32, %c0_i32_0 : i32, i32
  }
  func.func @transform_4(%arg0: i32, %arg1: i32) -> (i32, i32, i32) {
    %c0_i32 = arith.constant 0 : i32
    %c0_i32_0 = arith.constant 0 : i32
    return %arg0, %arg1, %c0_i32 : i32, i32, i32
  }
}

</mosaic_0001>

<bundles_post_ra>
// kernel: tpu_custom_call.1
= control target key start
LH: loop header
LB: loop body
LE: loop exit
PB: predicated region body
PF: predicated region fallthrough
CT: control target
= control target key end

     0   :  { %9 = vsyncpa [#allocation5], 0  ;;  %s2102_s0 = inlined_call_operand.vmem [shape: f32[2,8,384], index: 0, kind: input, shape index: {}]   ;;  %s2103_s1 = inlined_call_operand.vmem [shape: bf16[384,64], index: 1, kind: input, shape index: {}]   ;;  %s2104_s2 = inlined_call_operand.vmem [shape: bf16[384,64], index: 2, kind: input, shape index: {}]   ;;  %s2105_s3 = inlined_call_operand.vmem [shape: bf16[384,64], index: 3, kind: input, shape index: {}]   ;;  %s2106_s4 = inlined_call_operand.hbm [shape: f32[2,8,64], index: 4, kind: output, shape index: {}]  }
   0x1   :  { %11 = vsyncpa [#allocation5 + $0x1], 0  ;;  %s1736_s15 = smov 0   ;;  %s1738_s16 = smov 0  }
   0x2   :  { %s1740_s17 = smov 0   ;;  %s1742_s18 = smov 0  }
   0x3   :  { %s1744_s19 = smov 0   ;;  %s1746_s20 = smov 0  }
   0x4 LB: > { %s1129_s21 = sadd.s32 4294967295, %s1693_s20   ;;  %s1130_s22 = sadd.s32 4294967294, %s1693_s20   ;;  %s1693_s20 = sphi %s1746_s20, %s17_s20   ;;  %s1689_s19 = sphi %s1744_s19, %s2113_s19   ;;  %s1685_s18 = sphi %s1742_s18, %s2112_s18   ;;  %s1681_s17 = sphi %s1740_s17, %s2111_s17   ;;  %s1677_s16 = sphi %s1738_s16, %s2110_s16   ;;  %s1673_s15 = sphi %s1736_s15, %s2109_s15  }
   0x5   : > { %s29_s23 = sadd.s32 1, %s1689_s19  ;;  %s127_s24 = sadd.s32 1, %s1681_s17 }
   0x6   : > { %p31_p0 = scmp.ge.s32.totalorder %s29_s23, 2  ;;  %p137_p1 = scmp.ne.s32.totalorder %s1681_s17, %s1677_s16 }
   0x7   : > { %p138_p2 = scmp.eq.s32.totalorder %s1129_s21, 1  ;;  %p143_p3 = scmp.ne.s32.totalorder %s1677_s16, %s1673_s15 }
   0x8   : > { %s2115_s23 = smov (%p31_p0, %s29_s23), 0  ;;  %p144_p5 = scmp.eq.s32.totalorder %s1130_s22, 1 }
   0x9   : > { %p1776_p4 = por %p138_p2, %p137_p1  ;;  %s122_s26 = ssub.s32 %s1689_s19, %s2115_s23 }
   0xa   : > { %p1133_p6 = scmp.ge.s32.totalorder %s1693_s20, 1  ;;  %p125_p7 = scmp.eq.s32.totalorder %s122_s26, 0 }
   0xb   : > { %p1783_p8 = por %p144_p5, %p143_p3  ;;  %p179_p9 = scmp.lt.s32.totalorder %s1693_s20, 3 }
   0xc   : > { %s1789_s28 = scalar_select %p125_p7, %s1681_s17, %s127_s24  }
   0xd   : > { %p180_p10 = pnand %p1133_p6, %p179_p9 }
   0xe   : > { %s202_s29 = sand.u32 (!%p180_p10), 1, %s1677_s16   ;;  %p205_p11 = scmp.lt.s32.totalorder (!%p180_p10), %s1685_s18, 1 }
   0xf   : > { %183 = sbr.rel (%p180_p10) target bundleno = 658 (0x292), region = 36  ;;  %s1797_s6 = sshll.u32 (!%p180_p10), %s202_s29, 3 }
  0x10   : > { %s2040_s22 = smov (!%p180_p10), 0  }
  0x14   : > { %v1440_v0 = vld [vmem:[%s2104_s2 + $0x38] sm:$0xff]  ;;  %v1439_v3 = vld [vmem:[%s2104_s2 + $0x30] sm:$0xff]  ;;  %v1438_v8 = vld [vmem:[%s2104_s2 + $0x28] sm:$0xff]  ;;  %s206_s24 = scalar_select %p205_p11, %s1685_s18, 1  ;;  %vm453_vm0 = vcmask 519168  }
  0x15   : > { %v1448_v1 = vld [vmem:[%s2104_s2 + $0x78] sm:$0xff]  ;;  %413 = vmatpush.bf16.msra.mxu0 %v1440_v0  ;;  %v1447_v5 = vld [vmem:[%s2104_s2 + $0x70] sm:$0xff]  ;;  %v1446_v9 = vld [vmem:[%s2104_s2 + $0x68] sm:$0xff] }
  0x16   : > { %v1456_v2 = vld [vmem:[%s2104_s2 + $0xb8] sm:$0xff]  ;;  %426 = vmatpush.bf16.msra.mxu1 %v1448_v1  ;;  %v1455_v6 = vld [vmem:[%s2104_s2 + $0xb0] sm:$0xff]  ;;  %v1454_v10 = vld [vmem:[%s2104_s2 + $0xa8] sm:$0xff]  ;;  %s1505_s12 = smul.u32 24, %s206_s24 }
  0x17   : > { %v1464_v4 = vld [vmem:[%s2105_s3 + $0x38] sm:$0xff]  ;;  %439 = vmatpush.bf16.msra.mxu2 %v1456_v2  ;;  %v1463_v7 = vld [vmem:[%s2105_s3 + $0x30] sm:$0xff]  ;;  %v1462_v11 = vld [vmem:[%s2105_s3 + $0x28] sm:$0xff] }
  0x18   : > { %647 = vmatpush.bf16.msra.mxu3 %v1464_v4  ;;  %v1437_v12 = vld [vmem:[%s2104_s2 + $0x20] sm:$0xff]  ;;  %v1436_v16 = vld [vmem:[%s2104_s2 + $0x18] sm:$0xff]  ;;  %v1435_v20 = vld [vmem:[%s2104_s2 + $0x10] sm:$0xff]  ;;  %s209_s9 = scalar_lea.vmem %s2102_s0, %s1505_s12 }
  0x19   : > { %414 = vmatpush.bf16.msra.mxu0 %v1439_v3  ;;  %v1445_v13 = vld [vmem:[%s2104_s2 + $0x60] sm:$0xff]  ;;  %v1444_v17 = vld [vmem:[%s2104_s2 + $0x58] sm:$0xff]  ;;  %v1443_v21 = vld [vmem:[%s2104_s2 + $0x50] sm:$0xff] }
  0x1a   : > { %427 = vmatpush.bf16.msra.mxu1 %v1447_v5  ;;  %v1453_v14 = vld [vmem:[%s2104_s2 + $0xa0] sm:$0xff]  ;;  %v1452_v18 = vld [vmem:[%s2104_s2 + $0x98] sm:$0xff]  ;;  %v1451_v22 = vld [vmem:[%s2104_s2 + $0x90] sm:$0xff] }
  0x1b   : > { %440 = vmatpush.bf16.msra.mxu2 %v1455_v6  ;;  %v1461_v15 = vld [vmem:[%s2105_s3 + $0x20] sm:$0xff]  ;;  %v1460_v19 = vld [vmem:[%s2105_s3 + $0x18] sm:$0xff]  ;;  %v1459_v23 = vld [vmem:[%s2105_s3 + $0x10] sm:$0xff] }
  0x1c   : > { %648 = vmatpush.bf16.msra.mxu3 %v1463_v7  ;;  %v1434_v24 = vld [vmem:[%s2104_s2 + $0x8] sm:$0xff]  ;;  %v1433_v28 = vld [vmem:[%s2104_s2] sm:$0xff]  ;;  %v1472_v29 = vld [vmem:[%s2105_s3 + $0x78] sm:$0xff] }
  0x1d   : > { %415 = vmatpush.bf16.msra.mxu0 %v1438_v8  ;;  %v1442_v25 = vld [vmem:[%s2104_s2 + $0x48] sm:$0xff]  ;;  %v1441_v30 = vld [vmem:[%s2104_s2 + $0x40] sm:$0xff]  ;;  %v217_v34 = vld [vmem:[%s209_s9 + $0x10] sm:$0xff] }
  0x1e   : > { %428 = vmatpush.bf16.msra.mxu1 %v1446_v9  ;;  %v1450_v26 = vld [vmem:[%s2104_s2 + $0x88] sm:$0xff]  ;;  %v215_v31 = vld [vmem:[%s209_s9] sm:$0xff]  ;;  %v1480_v35 = vld [vmem:[%s2105_s3 + $0xb8] sm:$0xff]  ;;  %v1914_v41 = vpack.c.bf16 %v217_v34, %v217_v34 }
  0x1f   : > { %441 = vmatpush.bf16.msra.mxu2 %v1454_v10  ;;  %v1458_v27 = vld [vmem:[%s2105_s3 + $0x8] sm:$0xff]  ;;  %v1449_v32 = vld [vmem:[%s2104_s2 + $0x80] sm:$0xff]  ;;  %v1488_v36 = vld [vmem:[%s2103_s1 + $0x38] sm:$0xff]  ;;  %v1909_v39 = vpack.c.bf16 %v215_v31, %v215_v31 }
  0x20   : > { %649 = vmatpush.bf16.msra.mxu3 %v1462_v11  ;;  %v1457_v33 = vld [vmem:[%s2105_s3] sm:$0xff]  ;;  %v216_v37 = vld [vmem:[%s209_s9 + $0x8] sm:$0xff]  ;;  %v1496_v38 = vld [vmem:[%s2103_s1 + $0x78] sm:$0xff]  ;;  %s204_s9 = scalar_lea.vmem [#allocation4], %s1797_s6 }
  0x21   : > { %416 = vmatpush.bf16.msra.mxu0 %v1437_v12  ;;  %v1471_v40 = vld [vmem:[%s2105_s3 + $0x70] sm:$0xff]  ;;  %v1916_v42 = vpack.c.bf16 %v216_v37, %v216_v37  ;;  %v1470_v46 = vld [vmem:[%s2105_s3 + $0x68] sm:$0xff]  ;;  %v1469_v50 = vld [vmem:[%s2105_s3 + $0x60] sm:$0xff] }
  0x22   : > { %429 = vmatpush.bf16.msra.mxu1 %v1445_v13  ;;  %v1479_v43 = vld [vmem:[%s2105_s3 + $0xb0] sm:$0xff]  ;;  %v1478_v47 = vld [vmem:[%s2105_s3 + $0xa8] sm:$0xff]  ;;  %v1477_v51 = vld [vmem:[%s2105_s3 + $0xa0] sm:$0xff] }
  0x23   : > { %442 = vmatpush.bf16.msra.mxu2 %v1453_v14  ;;  %v1487_v44 = vld [vmem:[%s2103_s1 + $0x30] sm:$0xff]  ;;  %v1486_v48 = vld [vmem:[%s2103_s1 + $0x28] sm:$0xff]  ;;  %v1485_v52 = vld [vmem:[%s2103_s1 + $0x20] sm:$0xff] }
  0x24   : > { %650 = vmatpush.bf16.msra.mxu3 %v1461_v15  ;;  %v1495_v45 = vld [vmem:[%s2103_s1 + $0x70] sm:$0xff]  ;;  %v1494_v49 = vld [vmem:[%s2103_s1 + $0x68] sm:$0xff]  ;;  %v1493_v53 = vld [vmem:[%s2103_s1 + $0x60] sm:$0xff] }
  0x25   : > { %417 = vmatpush.bf16.msra.mxu0 %v1436_v16  ;;  %v1468_v54 = vld [vmem:[%s2105_s3 + $0x58] sm:$0xff]  ;;  %v1467_v58 = vld [vmem:[%s2105_s3 + $0x50] sm:$0xff]  ;;  %v1466_v62 = vld [vmem:[%s2105_s3 + $0x48] sm:$0xff] }
  0x26   : > { %430 = vmatpush.bf16.msra.mxu1 %v1444_v17  ;;  %v1476_v55 = vld [vmem:[%s2105_s3 + $0x98] sm:$0xff]  ;;  %v1475_v59 = vld [vmem:[%s2105_s3 + $0x90] sm:$0xff]  ;;  %v1474_v63 = vld [vmem:[%s2105_s3 + $0x88] sm:$0xff] }
  0x27   : > { %443 = vmatpush.bf16.msra.mxu2 %v1452_v18  ;;  %v1484_v56 = vld [vmem:[%s2103_s1 + $0x18] sm:$0xff]  ;;  %v1483_v60 = vld [vmem:[%s2103_s1 + $0x10] sm:$0xff]  ;;  %v1482_v0 = vld [vmem:[%s2103_s1 + $0x8] sm:$0xff] }
  0x28   : > { %651 = vmatpush.bf16.msra.mxu3 %v1460_v19  ;;  %v1492_v57 = vld [vmem:[%s2103_s1 + $0x58] sm:$0xff]  ;;  %v1491_v61 = vld [vmem:[%s2103_s1 + $0x50] sm:$0xff]  ;;  %v1490_v1 = vld [vmem:[%s2103_s1 + $0x48] sm:$0xff] }
  0x29   : > { %418 = vmatpush.bf16.msra.mxu0 %v1435_v20  ;;  %v1465_v2 = vld [vmem:[%s2105_s3 + $0x40] sm:$0xff]  ;;  %v1504_v3 = vld [vmem:[%s2103_s1 + $0xb8] sm:$0xff]  ;;  %v1503_v7 = vld [vmem:[%s2103_s1 + $0xb0] sm:$0xff] }
  0x2a   : > { %431 = vmatpush.bf16.msra.mxu1 %v1443_v21  ;;  %v1473_v4 = vld [vmem:[%s2105_s3 + $0x80] sm:$0xff]  ;;  %v1502_v8 = vld [vmem:[%s2103_s1 + $0xa8] sm:$0xff]  ;;  %v1500_v10 = vld [vmem:[%s2103_s1 + $0x98] sm:$0xff] }
  0x2b   : > { %444 = vmatpush.bf16.msra.mxu2 %v1451_v22  ;;  %v1481_v5 = vld [vmem:[%s2103_s1] sm:$0xff]  ;;  %v1499_v11 = vld [vmem:[%s2103_s1 + $0x90] sm:$0xff]  ;;  %v1498_v12 = vld [vmem:[%s2103_s1 + $0x88] sm:$0xff] }
  0x2c   : > { %652 = vmatpush.bf16.msra.mxu3 %v1459_v23  ;;  %v1489_v6 = vld [vmem:[%s2103_s1 + $0x40] sm:$0xff] }
  0x2d   : > { %419 = vmatpush.bf16.msra.mxu0 %v1434_v24  ;;  %v1501_v9 = vld [vmem:[%s2103_s1 + $0xa0] sm:$0xff] }
  0x2e   : > { %432 = vmatpush.bf16.msra.mxu1 %v1442_v25  ;;  %v1497_v13 = vld [vmem:[%s2103_s1 + $0x80] sm:$0xff] }
  0x2f   : > { %445 = vmatpush.bf16.msra.mxu2 %v1450_v26 }
  0x30   : > { %653 = vmatpush.bf16.msra.mxu3 %v1458_v27 }
  0x31   : > { %420 = vmatpush.bf16.msra.mxu0 %v1433_v28 }
  0x32   : > { %433 = vmatpush.bf16.msra.mxu1 %v1441_v30 }
  0x33   : > { %446 = vmatpush.bf16.msra.mxu2 %v1449_v32 }
  0x34   : > { %654 = vmatpush.bf16.msra.mxu3 %v1457_v33  ;;  %421 = vmatmul.bf16.vlgmr.msra.gmra.mxu0 %v1909_v39 }
  0x35   : > { %660 = vmatpush.bf16.msrb.mxu0 %v1472_v29  ;;  %434 = vmatmul.bf16.vlgmr.msra.gmra.mxu1 %v1916_v42  ;;  %v932_v29 = vlaneseq }
  0x36   : > { %673 = vmatpush.bf16.msrb.mxu1 %v1480_v35  ;;  %447 = vmatmul.bf16.vlgmr.msra.gmra.mxu2 %v1914_v41 }
  0x37   : > { %892 = vmatpush.bf16.msrb.mxu2 %v1488_v36  ;;  %655 = vmatmul.bf16.vlgmr.msra.gmra.mxu3 %v1909_v39  ;;  %v2033_v31 = vshrl.u32 %v932_v29, 7 }
  0x38   : > { %905 = vmatpush.bf16.msrb.mxu3 %v1496_v38 }
  0x39   : > { %661 = vmatpush.bf16.msrb.mxu0 %v1471_v40 }
  0x3a   : > { %674 = vmatpush.bf16.msrb.mxu1 %v1479_v43  ;;  %v1695_v43 = vmov 0.0  }
  0x3b   : > { %893 = vmatpush.bf16.msrb.mxu2 %v1487_v44  ;;  %v1699_v44 = vmov 0.0  }
  0x3c   : > { %906 = vmatpush.bf16.msrb.mxu3 %v1495_v45  ;;  %v1703_v45 = vmov -1e+30  }
  0x3d   : > { %662 = vmatpush.bf16.msrb.mxu0 %v1470_v46 }
  0x3e   : > { %675 = vmatpush.bf16.msrb.mxu1 %v1478_v47 }
  0x3f   : > { %894 = vmatpush.bf16.msrb.mxu2 %v1486_v48 }
  0x40   : > { %907 = vmatpush.bf16.msrb.mxu3 %v1494_v49 }
  0x41   : > { %663 = vmatpush.bf16.msrb.mxu0 %v1469_v50 }
  0x42   : > { %676 = vmatpush.bf16.msrb.mxu1 %v1477_v51 }
  0x43   : > { %895 = vmatpush.bf16.msrb.mxu2 %v1485_v52 }
  0x44   : > { %908 = vmatpush.bf16.msrb.mxu3 %v1493_v53 }
  0x45   : > { %664 = vmatpush.bf16.msrb.mxu0 %v1468_v54 }
  0x46   : > { %677 = vmatpush.bf16.msrb.mxu1 %v1476_v55 }
  0x47   : > { %896 = vmatpush.bf16.msrb.mxu2 %v1484_v56 }
  0x48   : > { %909 = vmatpush.bf16.msrb.mxu3 %v1492_v57 }
  0x49   : > { %665 = vmatpush.bf16.msrb.mxu0 %v1467_v58 }
  0x4a   : > { %678 = vmatpush.bf16.msrb.mxu1 %v1475_v59 }
  0x4b   : > { %897 = vmatpush.bf16.msrb.mxu2 %v1483_v60 }
  0x4c   : > { %910 = vmatpush.bf16.msrb.mxu3 %v1491_v61 }
  0x4d   : > { %666 = vmatpush.bf16.msrb.mxu0 %v1466_v62 }
  0x4e   : > { %679 = vmatpush.bf16.msrb.mxu1 %v1474_v63 }
  0x4f   : > { %898 = vmatpush.bf16.msrb.mxu2 %v1482_v0 }
  0x50   : > { %911 = vmatpush.bf16.msrb.mxu3 %v1490_v1 }
  0x51   : > { %667 = vmatpush.bf16.msrb.mxu0 %v1465_v2 }
  0x52   : > { %680 = vmatpush.bf16.msrb.mxu1 %v1473_v4 }
  0x53   : > { %899 = vmatpush.bf16.msrb.mxu2 %v1481_v5 }
  0x54   : > { %668 = vmatmul.bf16.vlgmr.msrb.gmra.mxu0 %v1916_v42  ;;  %912 = vmatpush.bf16.msrb.mxu3 %v1489_v6 }
  0x55   : > { %918 = vmatpush.bf16.msra.mxu0 %v1504_v3  ;;  %681 = vmatmul.bf16.vlgmr.msrb.gmra.mxu1 %v1914_v41 }
  0x56   : > { %900 = vmatmul.bf16.vlgmr.msrb.gmra.mxu2 %v1909_v39 }
  0x57   : > { %913 = vmatmul.bf16.vlgmr.msrb.gmra.mxu3 %v1916_v42 }
  0x59   : > { %919 = vmatpush.bf16.msra.mxu0 %v1503_v7 }
  0x5d   : > { %920 = vmatpush.bf16.msra.mxu0 %v1502_v8 }
  0x61   : > { %921 = vmatpush.bf16.msra.mxu0 %v1501_v9 }
  0x65   : > { %922 = vmatpush.bf16.msra.mxu0 %v1500_v10 }
  0x69   : > { %923 = vmatpush.bf16.msra.mxu0 %v1499_v11 }
  0x6d   : > { %924 = vmatpush.bf16.msra.mxu0 %v1498_v12 }
  0x71   : > { %925 = vmatpush.bf16.msra.mxu0 %v1497_v13 }
  0x74   : > { %926 = vmatmul.bf16.vlgmr.msra.gmra.mxu0 %v1914_v41 }
  0xb1   : > { %v422_v14 = vpop.f32.mrf.mxu0 }
  0xb2   : > { %v435_v15 = vpop.f32.mrf.mxu1 }
  0xb3   : > { %v436_v16 = vadd.f32 %v435_v15, %v422_v14 }
  0xb9   : > { %v448_v17 = vpop.f32.mrf.mxu2  ;;  %v424_v18 = vpop.f32.mrf.mxu0 }
  0xba   : > { %v449_v19 = vadd.f32 %v448_v17, %v436_v16  ;;  %v656_v20 = vpop.f32.mrf.mxu3  ;;  %v437_v22 = vpop.f32.mrf.mxu1 }
  0xbc   : > { %v452_v21 = vpack.c.bf16 %v449_v19, %v449_v19 }
  0xbe   : > { %454 = vst.msk [vmem:[#allocation2] sm:$0xf] %vm453_vm0, %v452_v21 }
  0xc1   : > { %v450_v23 = vpop.f32.mrf.mxu2 }
  0xc2   : > { %v658_v24 = vpop.f32.mrf.mxu3 }
  0xd1   : > { %v669_v25 = vpop.f32.mrf.mxu0 }
  0xd2   : > { %v670_v26 = vadd.f32 %v669_v25, %v656_v20  ;;  %v682_v27 = vpop.f32.mrf.mxu1 }
  0xd4   : > { %v683_v28 = vadd.f32 %v682_v27, %v670_v26 }
  0xd6   : > { %v686_v30 = vpack.c.bf16 %v683_v28, %v683_v28 }
  0xd8   : > { %687 = vst.msk [vmem:[#allocation3] sm:$0xf] %vm453_vm0, %v686_v30 }
  0xd9   : > { %v671_v32 = vpop.f32.mrf.mxu0  ;;  %v901_v33 = vpop.f32.mrf.mxu2 }
  0xda   : > { %v914_v34 = vpop.f32.mrf.mxu3  ;;  %v684_v35 = vpop.f32.mrf.mxu1 }
  0xdb   : > { %v915_v38 = vadd.f32 %v914_v34, %v901_v33 }
  0xe1   : > { %v903_v36 = vpop.f32.mrf.mxu2 }
  0xe2   : > { %v916_v37 = vpop.f32.mrf.mxu3 }
  0xf1   : > { %v927_v39 = vpop.f32.mrf.mxu0 }
  0xf2   : > { %v2035_v40 = vadd.f32 %v927_v39, %v915_v38 }
  0xf4   : > { %v931_v41 = vpack.c.bf16 %v2035_v40, %v2035_v40 }
  0xf9   : > { %v929_v42 = vpop.f32.mrf.mxu0 }
  0xfa LB: >> { %s1424_s26 = sshll.u32 %s1709_s22, 3  ;;  %vm955_vm1 = vcmask 523264   ;;  %v976_v48 = vand.u32 127, %v932_v29  ;;  %vm981_vm3 = vcmask 64512   ;;  %vm1002_vm4 = vcmask 1043456   ;;  %s940_s22 = sadd.s32 1, %s1709_s22   ;;  %s1709_s22 = sphi %s2040_s22, %s940_s22   ;;  %v1705_v45 = vphi %v1703_v45, %v1704_v45   ;;  %v1701_v44 = vphi %v1699_v44, %v1700_v44   ;;  %v1697_v43 = vphi %v1695_v43, %v1696_v43  }
  0xfb   : >> { %s947_s30 = sshra.s32 %s1424_s26, 3  ;;  %v977_v49 = vstv %s1424_s26  ;;  %p939_p12 = scmp.ge.s32.totalorder %s940_s22, 1 }
  0xfc   : >> { %s1425_s12 = sshll.u32 %s947_s30, 2  ;;  %v978_v50 = vadd.s32 %v977_v49, %v976_v48  ;;  %s1430_s24 = sshll.u32 (%p939_p12), %s1685_s18, 3 }
  0xfd   : >> { %s950_s5 = scalar_lea.vmem [#allocation2], %s1425_s12  ;;  %s953_s7 = scalar_lea.vmem [#allocation3], %s1425_s12 }
  0xfe   : >> { %v951_v46 = vld [vmem:[%s950_s5] sm:$0xf]  ;;  %vm979_vm2 = vcmp.le.s32.totalorder %v978_v50, %v2033_v31  ;;  %s1036_s11 = scalar_lea.hbm (%p939_p12), %s2106_s4, %s1430_s24  ;;  %s1038_s13 = sshll.u32 (%p939_p12), %s204_s9, 4  ;;  %s1039_s13 = int_to_ptr.vmem [resolvable:$true] %s1038_s13 }
  0xff   : >> { %v960_v47 = vsel %vm955_vm1, %v951_v46, 0  ;;  %v954_v55 = vld [vmem:[%s953_s7] sm:$0xf]  ;;  %s1040_s14 = sshll.u32 (%p939_p12), %s1036_s11, 4  ;;  %s1025_s21 = scalar_lea.sflag (%p939_p12), [#allocation5], %s202_s29  ;;  %s1041_s14 = int_to_ptr.hbm [resolvable:$true] %s1040_s14 }
 0x100   : >> { %969 = vmatpush.bf16.xpose.msra.mxu0 %v960_v47  ;;  %v1004_v56 = vsel %vm1002_vm4, %v954_v55, 0  ;;  %s1613_s22 = sshra.s32 (%p939_p12), %s1041_s14, 4  ;;  %s1619_s12 = scalar_lea.hbm (%p939_p12), %s2106_s4, 16  ;;  %s1614_s22 = int_to_ptr.hbm [resolvable:$true] %s1613_s22 }
 0x101   : >> { %1013 = vmatpush.bf16.msra.mxu1 %v1004_v56  ;;  %s1615_s26 = scalar_lea.hbm (%p939_p12), %s1614_s22, 8  ;;  %p1620_p2 = scmp.lt.s32.totalorder (%p939_p12), %s1614_s22, %s2106_s4 }
 0x102   : > { %p1616_p13 = scmp.ne.s32.totalorder (%p939_p12), %s1614_s22, %s1615_s26  ;;  %p1621_p3 = scmp.lt.s32.totalorder (%p939_p12), %s1619_s12, %s1615_s26 }
 0x104   : > { %p1617_p0 = pnand (%p939_p12), %p1616_p13, %p1776_p4  ;;  %p1622_p5 = por (%p939_p12), %p1621_p3, %p1620_p2 }
 0x106   : > { %p1618_p1 = pneg (%p939_p12), %p1617_p0 }
 0x107   : >> { %1427 = vmatmul.msk.bf16.vlgmr.msra.gmra.mxu0 %vm955_vm1, %v931_v41 }
 0x108   : > { %p1623_p6 = pnand (%p939_p12), %p1622_p5, %p1618_p1 }
 0x184   : >> { %v971_v51 = vpop.f32.mrf.mxu0 }
 0x185   : >> { %v980_v52 = vsel %vm979_vm2, %v971_v51, -1e+30 }
 0x186   : >> { %v982_v53 = vsel %vm981_vm3, %v980_v52, -inf }
 0x187   : >> { %983 = vmax.xlane.f32.xlu0 %v982_v53 }
 0x18c   : >> { %v973_v54 = vpop.f32.mrf.mxu0 }
 0x1fa   : >> { %v984_v57 = vpop.xlane.xlu0 %983 }
 0x1fb   : >> { %v985_v58 = vmax.f32 %v1705_v45, %v984_v57  }
 0x1fd   : >> { %v986_v59 = vsub.f32 %v1705_v45, %v985_v58  ;;  %v989_v60 = vsub.f32 %v980_v52, %v985_v58  ;;  %v1704_v45 = vmov %v985_v58  }
 0x1ff   : >> { %v990_v61 = vmul.f32 1.442695, %v989_v60  ;;  %v987_v1 = vmul.f32 1.442695, %v986_v59 }
 0x201   : >> { %1593 = vpow2.f32 %v990_v61 }
 0x202   : >> { %1595 = vpow2.f32 %v987_v1 }
 0x207   : >> { %v1594_v62 = vpop.eup %1593 }
 0x208   : >> { %v993_v63 = vsel %vm981_vm3, %v1594_v62, 0.0  ;;  %v998_v0 = vpack.c.bf16 %v1594_v62, %v1594_v62  ;;  %v1596_v2 = vpop.eup %1595 }
 0x209   : >> { %994 = vadd.xlane.f32.xlu0 %v993_v63  ;;  %v992_v3 = vmul.f32 %v1701_v44, %v1596_v2  ;;  %v997_v6 = vmul.f32 %v1697_v43, %v1596_v2 }
 0x20a   : >> { %1428 = vmatmul.msk.bf16.vlgmr.msra.gmra.mxu1 %vm981_vm3, %v998_v0 }
 0x27c   : >> { %v995_v4 = vpop.xlane.xlu0 %994 }
 0x27d   : >> { %v996_v5 = vadd.f32 %v995_v4, %v992_v3  }
 0x27f   : >> { %v1700_v44 = vmov %v996_v5   ;;  %1597 = vrcp.f32 (%p939_p12), %v996_v5 }
 0x285   : > { %v1598_v10 = vpop.eup (%p939_p12), %1597 }
 0x287   : >> { %v1015_v7 = vpop.f32.mrf.mxu1 }
 0x288   : >> { %v1019_v8 = vadd.f32 %v1015_v7, %v997_v6  }
 0x28a   : >> { %v1696_v43 = vmov %v1019_v8   ;;  %v1021_v11 = vmul.f32 (%p939_p12), %v1598_v10, %v1019_v8 }
 0x28b   : > { %942 = sbr.rel (!%p939_p12) target bundleno = 250 (0xfa), region = 85 }
 0x28c   : > { %1023 = vst.msk [vmem:[%s204_s9] sm:$0xff] (%p939_p12), %vm955_vm1, %v1021_v11 }
 0x28f   : >> { %v1017_v9 = vpop.f32.mrf.mxu1 }
 0x290   : > { %1626 = shalt.err (!%p1623_p6)
}
 0x291   : > { %1506 = dma.vmem_to_hbm [thread:$0]  (%p1776_p4), %s1039_s13, 128, %s1041_s14, %s1025_s21  }
 0x292 PF: > { %p1512_p7 = scmp.ge.s32.totalorder %s1693_s20, 2  ;;  %s1052_s29 = sand.u32 1, %s1673_s15  }
 0x293   : > { %s1053_s6 = scalar_lea.sflag [#allocation5], %s1052_s29 }
 0x294   : > { %p1509_p9 = pnand %p1512_p7, %p1783_p8 }
 0x296   : > { %p1510_p10 = pneg %p1509_p9 }
 0x298   : > { %1668 = dma.done.wait (%p1510_p10), %s1053_s6, 128  }
 0x299   : > { %1670 = vsyncadd (%p1510_p10), %s1053_s6, 4294967168  ;;  %s17_s20 = sadd.s32 1, %s1693_s20   ;;  %s2109_s15 = smov %s1677_s16 }
 0x29a   : > { %p14_p11 = scmp.ge.s32.totalorder %s17_s20, 4   ;;  %s2110_s16 = smov %s1681_s17 }
 0x29b   : > { %s2111_s17 = smov %s1789_s28  ;;  %s2112_s18 = smov %s1689_s19 }
 0x29c   : > { %s2113_s19 = smov %s2115_s23  ;;  %16 = sbr.rel (!%p14_p11) target bundleno = 4 (0x4), region = 96 }
 0x2a1   :  { %1059 = vsyncpa [#allocation5], 1 }
 0x2a2   :  { %1061 = vsyncpa [#allocation5 + $0x1], 1 }

</bundles_post_ra>
